<compile_context>
chip_gen: v5e
topology: v5e:2x2
jax: 0.10.0
libtpu: 0.0.40
codegen_flags: <defaults>
</compile_context>

<pallas_src>
import functools

import jax
import jax.numpy as jnp
from jax.experimental import pallas as pl
from jax.experimental.pallas import tpu as pltpu


# ----------------------------------------------------------------------------
# Tiled Pallas GEMM + bias kernel:  y = x @ W + b
# ----------------------------------------------------------------------------
# Tile sizes: lane-dense (multiples of 128) M/N tiles, K tile of 256.
TM, TN, TK = 128, 128, 256


def _linear_kernel(x_ref, w_ref, b_ref, o_ref):
    k = pl.program_id(2)

    @pl.when(k == 0)
    def _init():
        # Initialize the resident output tile with the bias (f32, added once).
        o_ref[...] = jnp.broadcast_to(b_ref[...], o_ref.shape)

    # bf16 x bf16 -> f32 accumulate on the MXU, directly into the f32 output
    # tile (it stays in VMEM across the whole k axis; writeback happens only
    # when the (i, j) output block changes).
    o_ref[...] += jnp.dot(x_ref[...], w_ref[...],
                          preferred_element_type=jnp.float32)


@functools.partial(jax.jit, static_argnames=("tm", "tn", "tk"))
def _pallas_linear_tiled(x, w, b, *, tm=TM, tn=TN, tk=TK):
    M, K = x.shape
    _, N = w.shape

    # bf16 at the kernel boundary (halves HBM/VMEM traffic, full-rate MXU);
    # bias + accumulation + output stay in f32.
    xb = x.astype(jnp.bfloat16)
    wb = w.astype(jnp.bfloat16)
    b2d = b.reshape(1, N).astype(jnp.float32)

    grid = (M // tm, N // tn, K // tk)
    flops = 2 * M * N * K
    bytes_accessed = (M * K) * 2 + (K * N) * 2 + N * 4 + (M * N) * 4

    return pl.pallas_call(
        _linear_kernel,
        out_shape=jax.ShapeDtypeStruct((M, N), jnp.float32),
        grid_spec=pltpu.PrefetchScalarGridSpec(
            num_scalar_prefetch=0,
            grid=grid,
            in_specs=[
                pl.BlockSpec((tm, tk), lambda i, j, k: (i, k)),   # x tile
                pl.BlockSpec((tk, tn), lambda i, j, k: (k, j)),   # W tile
                pl.BlockSpec((1, tn), lambda i, j, k: (0, j)),    # bias tile
            ],
            out_specs=pl.BlockSpec((tm, tn), lambda i, j, k: (i, j)),
        ),
        compiler_params=pltpu.CompilerParams(
            dimension_semantics=("parallel", "parallel", "arbitrary"),
            vmem_limit_bytes=32 * 1024 * 1024,  # safe on v5e/v6e/v7x
        ),
        cost_estimate=pl.CostEstimate(
            flops=flops, transcendentals=0, bytes_accessed=bytes_accessed),
    )(xb, wb, b2d)


def pallas_linear(x, w, b, *, tm=TM, tn=TN, tk=TK):
    """y = x @ w + b.  Pallas tiled GEMM for aligned shapes, XLA otherwise."""
    M, K = x.shape
    K2, N = w.shape
    assert K == K2
    aligned = (M % tm == 0) and (N % tn == 0) and (K % tk == 0)
    if aligned:
        return _pallas_linear_tiled(x, w, b, tm=tm, tn=tn, tk=tk)
    # Tiny / unaligned shapes: a 1-step pallas_call is pure launch overhead;
    # XLA already emits an optimal fused matmul+bias.
    return jnp.dot(x, w) + b


# ----------------------------------------------------------------------------
# The wrapped "module": a deterministic Linear layer using the Pallas kernel.
# ----------------------------------------------------------------------------
class PallasLinearModule:
    def __init__(self, d_in, d_out, key):
        kw, kb = jax.random.split(key)
        # deterministic init (mimics torch.nn.Linear's uniform(-1/sqrt(d), 1/sqrt(d)))
        bound = 1.0 / (d_in ** 0.5)
        self.w = jax.random.uniform(kw, (d_in, d_out), jnp.float32, -bound, bound)
        self.b = jax.random.uniform(kb, (d_out,), jnp.float32, -bound, bound)

    def __call__(self, x):
        return pallas_linear(x, self.w, self.b)


# ----------------------------------------------------------------------------
# NullDDP: exact semantics of the PyTorch module — pure delegation.
# ----------------------------------------------------------------------------
class NullDDP:
    """Dummy DDP wrapper for single device training (Pallas/JAX version)."""

    def __init__(self, module, *args, **kwargs):
        self.module = module
        self.require_backward_grad_sync = False

    def __call__(self, *args, **kwargs):
        # forward(*args, **kwargs) -> self.module(*args, **kwargs)
        return self.module(*args, **kwargs)


if __name__ == "__main__":
    key = jax.random.PRNGKey(0)
    k_param, k_x = jax.random.split(key)

    # Small-but-MXU-friendly demo shapes: multiple grid steps on every axis
    # (grid = (2, 2, 2)) so the bias-init / K-accumulate / writeback paths are
    # all exercised.
    B, D_in, D_out = 256, 512, 256

    inner = PallasLinearModule(D_in, D_out, k_param)
    model = NullDDP(inner)

    x = jax.random.normal(k_x, (B, D_in), jnp.float32)

    y = model(x)                      # NullDDP delegates -> Pallas tiled GEMM
    y = jax.block_until_ready(y)
    assert y.shape == (B, D_out)
    assert y.dtype == jnp.float32

    # Tight check against a same-precision reference (bf16 inputs, f32 acc).
    y_ref_bf16 = jnp.dot(x.astype(jnp.bfloat16), inner.w.astype(jnp.bfloat16),
                         preferred_element_type=jnp.float32) + inner.b
    assert jnp.allclose(y, y_ref_bf16, atol=2e-3, rtol=2e-3)

    # Loose check against the full-f32 module semantics (bf16 cast tolerance).
    y_ref_f32 = x @ inner.w + inner.b
    assert jnp.allclose(y, y_ref_f32, atol=5e-2, rtol=5e-2)

    print("KERNEL_OK")
</pallas_src>

<mosaic_0001>
module attributes {stable_mosaic.version = 11 : i64} {
  func.func @_linear_kernel(%arg0: i32, %arg1: i32, %arg2: i32, %arg3: memref<128x256xbf16, #tpu.memory_space<vmem>>, %arg4: memref<256x128xbf16, #tpu.memory_space<vmem>>, %arg5: memref<1x128xf32, #tpu.memory_space<vmem>>, %arg6: memref<128x128xf32, #tpu.memory_space<vmem>>) attributes {dimension_semantics = [#tpu.dimension_semantics<parallel>, #tpu.dimension_semantics<parallel>, #tpu.dimension_semantics<arbitrary>], iteration_bounds = array<i64: 2, 2, 2>, scalar_prefetch = 0 : i64, scratch_operands = 0 : i64, tpu.core_type = #tpu.core_type<tc>, window_params = [{transform_indices = @transform_0, window_bounds = array<i64: 128, 256>}, {transform_indices = @transform_1, window_bounds = array<i64: 256, 128>}, {transform_indices = @transform_2, window_bounds = array<i64: 1, 128>}, {transform_indices = @transform_3, window_bounds = array<i64: 128, 128>}]} {
    %c0_i32 = arith.constant 0 : i32
    %0 = arith.cmpi eq, %arg2, %c0_i32 : i32
    %1 = arith.extui %0 : i1 to i32
    %c0_i32_0 = arith.constant 0 : i32
    %2 = arith.cmpi ne, %1, %c0_i32_0 : i32
    scf.if %2 {
      %c0_8 = arith.constant 0 : index
      %c0_9 = arith.constant 0 : index
      %9 = vector.load %arg5[%c0_8, %c0_9] : memref<1x128xf32, #tpu.memory_space<vmem>>, vector<1x128xf32>
      %10 = vector.shape_cast %9 : vector<1x128xf32> to vector<1x128xf32>
      %11 = vector.broadcast %10 : vector<1x128xf32> to vector<128x128xf32>
      %c0_10 = arith.constant 0 : index
      %c0_11 = arith.constant 0 : index
      %12 = vector.load %arg6[%c0_10, %c0_11] : memref<128x128xf32, #tpu.memory_space<vmem>>, vector<128x128xf32>
      tpu.vector_store %arg6[%c0_10, %c0_11], %11 {strides = array<i32>} : memref<128x128xf32, #tpu.memory_space<vmem>>, vector<128x128xf32>,
    } else {
    }
    %c0 = arith.constant 0 : index
    %c0_1 = arith.constant 0 : index
    %3 = vector.load %arg6[%c0, %c0_1] : memref<128x128xf32, #tpu.memory_space<vmem>>, vector<128x128xf32>
    %c0_2 = arith.constant 0 : index
    %c0_3 = arith.constant 0 : index
    %4 = vector.load %arg3[%c0_2, %c0_3] : memref<128x256xbf16, #tpu.memory_space<vmem>>, vector<128x256xbf16>
    %c0_4 = arith.constant 0 : index
    %c0_5 = arith.constant 0 : index
    %5 = vector.load %arg4[%c0_4, %c0_5] : memref<256x128xbf16, #tpu.memory_space<vmem>>, vector<256x128xbf16>
    %cst = arith.constant dense<0.000000e+00> : vector<128x128xf32>
    %6 = tpu.matmul %4, %5, %cst {dimension_numbers = #tpu.dot_dimension_numbers<[1], [0], [0], [1], [0, 0, 1, 1], [], []>} : vector<128x256xbf16>, vector<256x128xbf16>, vector<128x128xf32> -> vector<128x128xf32>
    %7 = arith.addf %3, %6 : vector<128x128xf32>
    %c0_6 = arith.constant 0 : index
    %c0_7 = arith.constant 0 : index
    %8 = vector.load %arg6[%c0_6, %c0_7] : memref<128x128xf32, #tpu.memory_space<vmem>>, vector<128x128xf32>
    tpu.vector_store %arg6[%c0_6, %c0_7], %7 {strides = array<i32>} : memref<128x128xf32, #tpu.memory_space<vmem>>, vector<128x128xf32>,
    return
  }
  func.func @transform_0(%arg0: i32, %arg1: i32, %arg2: i32) -> (i32, i32) {
    %c0_i32 = arith.constant 0 : i32
    return %arg0, %arg2 : i32, i32
  }
  func.func @transform_1(%arg0: i32, %arg1: i32, %arg2: i32) -> (i32, i32) {
    %c0_i32 = arith.constant 0 : i32
    return %arg2, %arg1 : i32, i32
  }
  func.func @transform_2(%arg0: i32, %arg1: i32, %arg2: i32) -> (i32, i32) {
    %c0_i32 = arith.constant 0 : i32
    %c0_i32_0 = arith.constant 0 : i32
    return %c0_i32, %arg1 : i32, i32
  }
  func.func @transform_3(%arg0: i32, %arg1: i32, %arg2: i32) -> (i32, i32) {
    %c0_i32 = arith.constant 0 : i32
    return %arg0, %arg1 : i32, i32
  }
}

</mosaic_0001>

<bundles_post_ra>
// kernel: _pallas_linear_tiled.1
= control target key start
LH: loop header
LB: loop body
LE: loop exit
PB: predicated region body
PF: predicated region fallthrough
CT: control target
= control target key end

     0   :  { %s1943_s0 = inlined_call_operand.vmem [shape: bf16[256,512], index: 0, kind: input, shape index: {}]   ;;  %s1944_s1 = inlined_call_operand.vmem [shape: bf16[512,256], index: 1, kind: input, shape index: {}]   ;;  %s1945_s2 = inlined_call_operand.vmem [shape: f32[1,256], index: 2, kind: input, shape index: {}]   ;;  %s1946_s3 = inlined_call_operand.hbm [shape: f32[256,256], index: 3, kind: output, shape index: {}]  }
   0x1   :  { %1952 = sst [smem:[#allocation13_spill]] %s1943_s0 }
   0x2   :  { %1953 = sst [smem:[#allocation14_spill]] %s1944_s1 }
   0x3   :  { %1954 = sst [smem:[#allocation15_spill]] %s1945_s2 }
   0x4   :  { %1955 = sst [smem:[#allocation16_spill]] %s1946_s3 }
   0x5   :  { %8 = vsyncpa [#allocation5], 0 }
   0x6   :  { %10 = vsyncpa [#allocation5 + $0x1], 0  ;;  %s1525_s12 = smov 0   ;;  %s1527_s13 = smov 0  }
   0x7   :  { %s1529_s14 = smov 0   ;;  %s1531_s15 = smov 0  }
   0x8   :  { %s1533_s16 = smov 0   ;;  %s1535_s17 = smov 0  }
   0x9   :  { %s1537_s18 = smov 0   ;;  %s1539_s19 = smov 0  }
   0xa   :  { %s1541_s20 = smov 0   ;;  %s1543_s21 = smov 0  }
   0xb   :  { %s1545_s22 = smov 0   ;;  %s1547_s23 = smov 0  }
   0xc   :  { %s1549_s24 = smov 0   ;;  %s1551_s25 = smov 0  }
   0xd LB: > { %1956 = sst [smem:[#allocation7_spill]] %s1476_s19  ;;  %s28_s28 = sadd.s32 1, %s1488_s22  ;;  %s1500_s25 = sphi %s1551_s25, %s16_s25   ;;  %s1496_s24 = sphi %s1549_s24, %s1978_s24   ;;  %s1492_s23 = sphi %s1547_s23, %s1990_s23   ;;  %s1488_s22 = sphi %s1545_s22, %s1989_s22   ;;  %s1484_s21 = sphi %s1543_s21, %s1988_s21   ;;  %s1480_s20 = sphi %s1541_s20, %s1987_s20   ;;  %s1476_s19 = sphi %s1539_s19, %s1986_s19   ;;  %s1472_s18 = sphi %s1537_s18, %s1985_s18   ;;  %s1468_s17 = sphi %s1535_s17, %s1984_s17   ;;  %s1464_s16 = sphi %s1533_s16, %s1983_s16   ;;  %s1460_s15 = sphi %s1531_s15, %s1982_s15   ;;  %s1456_s14 = sphi %s1529_s14, %s1981_s14   ;;  %s1452_s13 = sphi %s1527_s13, %s1980_s13   ;;  %s1448_s12 = sphi %s1525_s12, %s1979_s12  }
   0xe   : > { %1957 = sst [smem:[#allocation8_spill]] %s1484_s21  ;;  %s31_s29 = sadd.s32 1, %s1492_s23 }
   0xf   : > { %1958 = sst [smem:[#allocation9_spill]] %s1496_s24  ;;  %p29_p0 = scmp.ge.s32.totalorder %s28_s28, 2 }
  0x10   : > { %s35_s30 = sadd.s32 1, %s1496_s24  ;;  %s44_s4 = sadd.s32 1, %s1472_s18 }
  0x11   : > { %p51_p1 = scmp.ne.s32.totalorder %s1472_s18, %s1468_s17  ;;  %s1992_s28 = smov (%p29_p0, %s28_s28), 0 }
  0x12   : > { %1959 = sst [smem:[#allocation10_spill]] %s1992_s28  ;;  %s1994_s29 = smov (!%p29_p0, %s31_s29), %s1492_s23 }
  0x13   : > { %s40_s5 = ssub.s32 %s1488_s22, %s1992_s28  ;;  %p52_p2 = scmp.eq.s32.totalorder %s1500_s25, 0 }
  0x14   : > { %p33_p3 = scmp.ge.s32.totalorder %s1994_s29, 2  ;;  %s72_s6 = sadd.s32 1, %s1464_s16 }
  0x15   : > { %p1610_p4 = por %p52_p2, %p51_p1  ;;  %p79_p5 = scmp.ne.s32.totalorder %s1464_s16, %s1460_s15 }
  0x16   : > { %s1996_s29 = smov (%p33_p3, %s1994_s29), 0  ;;  %s1998_s30 = smov (!%p33_p3, %s35_s30), %s1496_s24 }
  0x17   : > { %1961 = sst [smem:[#allocation11_spill]] %s1996_s29  ;;  %s68_s8 = ssub.s32 %s1492_s23, %s1996_s29 }
  0x18   : > { %p1621_p6 = por %p79_p5, %p52_p2  ;;  %p37_p7 = scmp.ge.s32.totalorder %s1998_s30, 2 }
  0x19   : > { %s69_s10 = sor.u32 %s68_s8, %s40_s5  ;;  %s126_s11 = sadd.s32 1, %s1456_s14 }
  0x1a   : > { %p70_p8 = scmp.eq.s32.totalorder %s69_s10, 0  ;;  %s2000_s30 = smov (%p37_p7, %s1998_s30), 0 }
  0x1b   : > { %1963 = sst [smem:[#allocation12_spill]] %s2000_s30  ;;  %s39_s26 = ssub.s32 %s1496_s24, %s2000_s30 }
  0x1c   : > { %s1629_s27 = scalar_select %p70_p8, %s1464_s16, %s72_s6  }
  0x1d   : > { %p136_p9 = scmp.ne.s32.totalorder %s1456_s14, %s1452_s13  ;;  %s41_s28 = sor.u32 %s40_s5, %s39_s26 }
  0x1e   : > { %s123_s29 = sor.u32 %s68_s8, %s39_s26  ;;  %p42_p10 = scmp.eq.s32.totalorder %s41_s28, 0 }
  0x1f   : > { %p124_p11 = scmp.eq.s32.totalorder %s123_s29, 0  ;;  %s1964_s3 = sadd.s32 4294967295, %s1500_s25  }
  0x20   : > { %p137_p12 = scmp.eq.s32.totalorder %s1964_s3, 7  ;;  %p142_p13 = scmp.ne.s32.totalorder %s1452_s13, %s1448_s12 }
  0x21   : > { %s1640_s21 = scalar_select %p42_p10, %s1472_s18, %s44_s4  }
  0x22   : > { %s1643_s19 = scalar_select %p124_p11, %s1456_s14, %s126_s11  }
  0x23   : > { %p1645_p0 = por %p137_p12, %p136_p9  ;;  %s1966_s2 = sadd.s32 4294967294, %s1500_s25  }
  0x24   : > { %p143_p1 = scmp.eq.s32.totalorder %s1966_s2, 7  ;;  %p1035_p3 = scmp.ge.s32.totalorder %s1500_s25, 8 }
  0x26   : > { %p1651_p2 = por %p143_p1, %p142_p13  ;;  %159 = sbr.rel (%p1035_p3) target bundleno = 111 (0x6f), region = 16 }
  0x2b   : > { %162 = sbr.rel (!%p1610_p4) target bundleno = 69 (0x45), region = 20  ;;  %s164_s3 = sand.u32 (%p1610_p4), 1, %s1472_s18  }
  0x2c   : > { %s1038_s26 = sshll.u32 (%p1610_p4), %s1488_s22, 1  ;;  %s1036_s28 = sshll.u32 (%p1610_p4), %s164_s3, 7 }
  0x2d   : > { %s1184_s29 = sshll.u32 (%p1610_p4), %s1496_s24, 6  ;;  %s1968_s0 = sld [smem:[#allocation13_spill]] (%p1610_p4) }
  0x2e   : > { %s170_s4 = sadd.s32 (%p1610_p4), %s1184_s29, %s1038_s26  ;;  %s166_s7 = scalar_lea.vmem (%p1610_p4), [#allocation2], %s1036_s28 }
  0x2f   : > { %s1040_s5 = sshll.u32 (%p1610_p4), %s170_s4, 2 }
  0x33   : > { %s1664_s11 = scalar_lea.vmem %s1968_s0, %s1040_s5 }
  0x34   : > { %v231_v0 = vld [vmem:[%s1664_s11] sm:$0xff]  ;;  %v233_v1 = vld [vmem:[%s1664_s11 + $0x10] sm:$0xff] }
  0x35   : > { %v235_v2 = vld [vmem:[%s1664_s11 + $0x20] sm:$0xff]  ;;  %232 = vst [vmem:[%s166_s7] sm:$0xff] %v231_v0  ;;  %v237_v3 = vld [vmem:[%s1664_s11 + $0x30] sm:$0xff] }
  0x36   : > { %234 = vst [vmem:[%s166_s7 + $0x8] sm:$0xff] %v233_v1  ;;  %v239_v4 = vld [vmem:[%s1664_s11 + $0x40] sm:$0xff]  ;;  %v241_v5 = vld [vmem:[%s1664_s11 + $0x50] sm:$0xff] }
  0x37   : > { %236 = vst [vmem:[%s166_s7 + $0x10] sm:$0xff] %v235_v2  ;;  %v243_v6 = vld [vmem:[%s1664_s11 + $0x60] sm:$0xff]  ;;  %v245_v7 = vld [vmem:[%s1664_s11 + $0x70] sm:$0xff] }
  0x38   : > { %238 = vst [vmem:[%s166_s7 + $0x18] sm:$0xff] %v237_v3  ;;  %v247_v8 = vld [vmem:[%s1664_s11 + $0x80] sm:$0xff]  ;;  %v249_v9 = vld [vmem:[%s1664_s11 + $0x90] sm:$0xff] }
  0x39   : > { %240 = vst [vmem:[%s166_s7 + $0x20] sm:$0xff] %v239_v4  ;;  %v251_v10 = vld [vmem:[%s1664_s11 + $0xa0] sm:$0xff]  ;;  %v253_v11 = vld [vmem:[%s1664_s11 + $0xb0] sm:$0xff] }
  0x3a   : > { %242 = vst [vmem:[%s166_s7 + $0x28] sm:$0xff] %v241_v5  ;;  %v255_v12 = vld [vmem:[%s1664_s11 + $0xc0] sm:$0xff]  ;;  %v257_v13 = vld [vmem:[%s1664_s11 + $0xd0] sm:$0xff] }
  0x3b   : > { %244 = vst [vmem:[%s166_s7 + $0x30] sm:$0xff] %v243_v6  ;;  %v259_v14 = vld [vmem:[%s1664_s11 + $0xe0] sm:$0xff]  ;;  %v261_v15 = vld [vmem:[%s1664_s11 + $0xf0] sm:$0xff] }
  0x3c   : > { %246 = vst [vmem:[%s166_s7 + $0x38] sm:$0xff] %v245_v7 }
  0x3d   : > { %248 = vst [vmem:[%s166_s7 + $0x40] sm:$0xff] %v247_v8 }
  0x3e   : > { %250 = vst [vmem:[%s166_s7 + $0x48] sm:$0xff] %v249_v9 }
  0x3f   : > { %252 = vst [vmem:[%s166_s7 + $0x50] sm:$0xff] %v251_v10 }
  0x40   : > { %254 = vst [vmem:[%s166_s7 + $0x58] sm:$0xff] %v253_v11 }
  0x41   : > { %256 = vst [vmem:[%s166_s7 + $0x60] sm:$0xff] %v255_v12 }
  0x42   : > { %258 = vst [vmem:[%s166_s7 + $0x68] sm:$0xff] %v257_v13 }
  0x43   : > { %260 = vst [vmem:[%s166_s7 + $0x70] sm:$0xff] %v259_v14 }
  0x44   : > { %262 = vst [vmem:[%s166_s7 + $0x78] sm:$0xff] %v261_v15 }
  0x45 PF: > { %268 = sbr.rel (!%p1621_p6) target bundleno = 111 (0x6f), region = 58  ;;  %s270_s3 = sand.u32 (%p1621_p6), 1, %s1464_s16  }
  0x46   : > { %s1185_s26 = sshll.u32 (%p1621_p6), %s1488_s22, 6  ;;  %s1041_s28 = sshll.u32 (%p1621_p6), %s270_s3, 7 }
  0x47   : > { %s275_s29 = sadd.s32 (%p1621_p6), %s1492_s23, %s1185_s26  ;;  %s1969_s1 = sld [smem:[#allocation14_spill]] (%p1621_p6) }
  0x48   : > { %s1044_s4 = sshll.u32 (%p1621_p6), %s275_s29, 2  ;;  %s1695_s9 = scalar_lea.vmem (%p1621_p6), [#allocation3], %s1041_s28 }
  0x4d   : > { %s1690_s8 = scalar_lea.vmem %s1969_s1, %s1044_s4 }
  0x4e   : > { %v294_v16 = vld [vmem:[%s1690_s8] sm:$0xf]  ;;  %v296_v17 = vld [vmem:[%s1690_s8 + $0x8] sm:$0xf]  ;;  %v298_v18 = vld [vmem:[%s1690_s8 + $0x10] sm:$0xf] }
  0x4f   : > { %295 = vst [vmem:[%s1695_s9] sm:$0xf] %v294_v16  ;;  %v300_v19 = vld [vmem:[%s1690_s8 + $0x18] sm:$0xf]  ;;  %v302_v20 = vld [vmem:[%s1690_s8 + $0x20] sm:$0xf] }
  0x50   : > { %297 = vst [vmem:[%s1695_s9 + $0x4] sm:$0xf] %v296_v17  ;;  %v304_v21 = vld [vmem:[%s1690_s8 + $0x28] sm:$0xf]  ;;  %v306_v22 = vld [vmem:[%s1690_s8 + $0x30] sm:$0xf] }
  0x51   : > { %299 = vst [vmem:[%s1695_s9 + $0x8] sm:$0xf] %v298_v18  ;;  %v308_v23 = vld [vmem:[%s1690_s8 + $0x38] sm:$0xf]  ;;  %v310_v24 = vld [vmem:[%s1690_s8 + $0x40] sm:$0xf] }
  0x52   : > { %301 = vst [vmem:[%s1695_s9 + $0xc] sm:$0xf] %v300_v19  ;;  %v312_v25 = vld [vmem:[%s1690_s8 + $0x48] sm:$0xf]  ;;  %v314_v26 = vld [vmem:[%s1690_s8 + $0x50] sm:$0xf] }
  0x53   : > { %303 = vst [vmem:[%s1695_s9 + $0x10] sm:$0xf] %v302_v20  ;;  %v316_v27 = vld [vmem:[%s1690_s8 + $0x58] sm:$0xf]  ;;  %v318_v28 = vld [vmem:[%s1690_s8 + $0x60] sm:$0xf] }
  0x54   : > { %305 = vst [vmem:[%s1695_s9 + $0x14] sm:$0xf] %v304_v21  ;;  %v320_v29 = vld [vmem:[%s1690_s8 + $0x68] sm:$0xf]  ;;  %v322_v30 = vld [vmem:[%s1690_s8 + $0x70] sm:$0xf] }
  0x55   : > { %307 = vst [vmem:[%s1695_s9 + $0x18] sm:$0xf] %v306_v22  ;;  %v324_v31 = vld [vmem:[%s1690_s8 + $0x78] sm:$0xf]  ;;  %v326_v32 = vld [vmem:[%s1690_s8 + $0x80] sm:$0xf] }
  0x56   : > { %309 = vst [vmem:[%s1695_s9 + $0x1c] sm:$0xf] %v308_v23  ;;  %v328_v33 = vld [vmem:[%s1690_s8 + $0x88] sm:$0xf]  ;;  %v330_v34 = vld [vmem:[%s1690_s8 + $0x90] sm:$0xf] }
  0x57   : > { %311 = vst [vmem:[%s1695_s9 + $0x20] sm:$0xf] %v310_v24  ;;  %v332_v35 = vld [vmem:[%s1690_s8 + $0x98] sm:$0xf]  ;;  %v334_v36 = vld [vmem:[%s1690_s8 + $0xa0] sm:$0xf] }
  0x58   : > { %313 = vst [vmem:[%s1695_s9 + $0x24] sm:$0xf] %v312_v25  ;;  %v336_v37 = vld [vmem:[%s1690_s8 + $0xa8] sm:$0xf]  ;;  %v338_v38 = vld [vmem:[%s1690_s8 + $0xb0] sm:$0xf] }
  0x59   : > { %315 = vst [vmem:[%s1695_s9 + $0x28] sm:$0xf] %v314_v26  ;;  %v340_v39 = vld [vmem:[%s1690_s8 + $0xb8] sm:$0xf]  ;;  %v342_v40 = vld [vmem:[%s1690_s8 + $0xc0] sm:$0xf] }
  0x5a   : > { %317 = vst [vmem:[%s1695_s9 + $0x2c] sm:$0xf] %v316_v27  ;;  %v344_v41 = vld [vmem:[%s1690_s8 + $0xc8] sm:$0xf]  ;;  %v346_v42 = vld [vmem:[%s1690_s8 + $0xd0] sm:$0xf] }
  0x5b   : > { %319 = vst [vmem:[%s1695_s9 + $0x30] sm:$0xf] %v318_v28  ;;  %v348_v43 = vld [vmem:[%s1690_s8 + $0xd8] sm:$0xf]  ;;  %v350_v44 = vld [vmem:[%s1690_s8 + $0xe0] sm:$0xf] }
  0x5c   : > { %321 = vst [vmem:[%s1695_s9 + $0x34] sm:$0xf] %v320_v29  ;;  %v352_v45 = vld [vmem:[%s1690_s8 + $0xe8] sm:$0xf]  ;;  %v354_v46 = vld [vmem:[%s1690_s8 + $0xf0] sm:$0xf] }
  0x5d   : > { %323 = vst [vmem:[%s1695_s9 + $0x38] sm:$0xf] %v322_v30  ;;  %v356_v47 = vld [vmem:[%s1690_s8 + $0xf8] sm:$0xf] }
  0x5e   : > { %325 = vst [vmem:[%s1695_s9 + $0x3c] sm:$0xf] %v324_v31 }
  0x5f   : > { %327 = vst [vmem:[%s1695_s9 + $0x40] sm:$0xf] %v326_v32 }
  0x60   : > { %329 = vst [vmem:[%s1695_s9 + $0x44] sm:$0xf] %v328_v33 }
  0x61   : > { %331 = vst [vmem:[%s1695_s9 + $0x48] sm:$0xf] %v330_v34 }
  0x62   : > { %333 = vst [vmem:[%s1695_s9 + $0x4c] sm:$0xf] %v332_v35 }
  0x63   : > { %335 = vst [vmem:[%s1695_s9 + $0x50] sm:$0xf] %v334_v36 }
  0x64   : > { %337 = vst [vmem:[%s1695_s9 + $0x54] sm:$0xf] %v336_v37 }
  0x65   : > { %339 = vst [vmem:[%s1695_s9 + $0x58] sm:$0xf] %v338_v38 }
  0x66   : > { %341 = vst [vmem:[%s1695_s9 + $0x5c] sm:$0xf] %v340_v39 }
  0x67   : > { %343 = vst [vmem:[%s1695_s9 + $0x60] sm:$0xf] %v342_v40 }
  0x68   : > { %345 = vst [vmem:[%s1695_s9 + $0x64] sm:$0xf] %v344_v41 }
  0x69   : > { %347 = vst [vmem:[%s1695_s9 + $0x68] sm:$0xf] %v346_v42 }
  0x6a   : > { %349 = vst [vmem:[%s1695_s9 + $0x6c] sm:$0xf] %v348_v43 }
  0x6b   : > { %351 = vst [vmem:[%s1695_s9 + $0x70] sm:$0xf] %v350_v44 }
  0x6c   : > { %353 = vst [vmem:[%s1695_s9 + $0x74] sm:$0xf] %v352_v45 }
  0x6d   : > { %355 = vst [vmem:[%s1695_s9 + $0x78] sm:$0xf] %v354_v46 }
  0x6e   : > { %357 = vst [vmem:[%s1695_s9 + $0x7c] sm:$0xf] %v356_v47 }
  0x6f PF: > { %p1045_p4 = scmp.ge.s32.totalorder %s1500_s25, 1  ;;  %p450_p5 = scmp.lt.s32.totalorder %s1500_s25, 9 }
  0x71   : > { %p451_p6 = pnand %p1045_p4, %p450_p5 }
  0x72   : > { %s457_s11 = sand.u32 (!%p451_p6), 1, %s1468_s17   ;;  %s464_s7 = sand.u32 (!%p451_p6), 1, %s1460_s15  }
  0x73   : > { %454 = sbr.rel (%p451_p6) target bundleno = 381 (0x17d), region = 103  ;;  %s1046_s3 = sshll.u32 (!%p451_p6), %s457_s11, 7 }
  0x74   : > { %s1047_s26 = sshll.u32 (!%p451_p6), %s464_s7, 7  ;;  %s491_s28 = sand.u32 (!%p451_p6), 1, %s1452_s13  }
  0x75   : > { %p497_p7 = scmp.lt.s32.totalorder (!%p451_p6), %s1480_s20, 1  ;;  %s1048_s29 = sshll.u32 (!%p451_p6), %s491_s28, 7 }
  0x76   : > { %s1970_s8 = sld [smem:[#allocation15_spill]] (!%p451_p6)  ;;  %s1770_s0 = scalar_lea.vmem (!%p451_p6), [#allocation2], %s1046_s3 }
  0x77   : > { %s1772_s1 = scalar_lea.vmem (!%p451_p6), [#allocation3], %s1047_s26  ;;  %s1774_s30 = scalar_lea.vmem (!%p451_p6), [#allocation4], %s1048_s29 }
  0x78   : > { %s498_s4 = scalar_select %p497_p7, %s1480_s20, 1 }
  0x79   : > { %s1971_s24 = sld [smem:[#allocation7_spill]] }
  0x7c   : > { %s499_s9 = scalar_lea.vmem %s1970_s8, %s498_s4 }
  0x7f   : > { %p1049_p8 = scmp.ne.s32.totalorder %s1971_s24, 0 }
  0x81   : > { %504 = sbr.rel (%p1049_p8) target bundleno = 151 (0x97), region = 115 }
  0x86   : > { %v1357_v48 = vld [vmem:[%s499_s9] ss:$0 sm:$0xff] }
  0x87   : > { %509 = vst [vmem:[%s1774_s30] sm:$0xff] %v1357_v48 }
  0x88   : > { %510 = vst [vmem:[%s1774_s30 + $0x8] sm:$0xff] %v1357_v48 }
  0x89   : > { %511 = vst [vmem:[%s1774_s30 + $0x10] sm:$0xff] %v1357_v48 }
  0x8a   : > { %512 = vst [vmem:[%s1774_s30 + $0x18] sm:$0xff] %v1357_v48 }
  0x8b   : > { %513 = vst [vmem:[%s1774_s30 + $0x20] sm:$0xff] %v1357_v48 }
  0x8c   : > { %514 = vst [vmem:[%s1774_s30 + $0x28] sm:$0xff] %v1357_v48 }
  0x8d   : > { %515 = vst [vmem:[%s1774_s30 + $0x30] sm:$0xff] %v1357_v48 }
  0x8e   : > { %516 = vst [vmem:[%s1774_s30 + $0x38] sm:$0xff] %v1357_v48 }
  0x8f   : > { %517 = vst [vmem:[%s1774_s30 + $0x40] sm:$0xff] %v1357_v48 }
  0x90   : > { %518 = vst [vmem:[%s1774_s30 + $0x48] sm:$0xff] %v1357_v48 }
  0x91   : > { %519 = vst [vmem:[%s1774_s30 + $0x50] sm:$0xff] %v1357_v48 }
  0x92   : > { %520 = vst [vmem:[%s1774_s30 + $0x58] sm:$0xff] %v1357_v48 }
  0x93   : > { %521 = vst [vmem:[%s1774_s30 + $0x60] sm:$0xff] %v1357_v48 }
  0x94   : > { %522 = vst [vmem:[%s1774_s30 + $0x68] sm:$0xff] %v1357_v48 }
  0x95   : > { %523 = vst [vmem:[%s1774_s30 + $0x70] sm:$0xff] %v1357_v48 }
  0x96   : > { %524 = vst [vmem:[%s1774_s30 + $0x78] sm:$0xff] %v1357_v48 }
  0x97 PF: > { %v1209_v49 = vld [vmem:[%s1772_s1 + $0x38] sm:$0xff]  ;;  %v1208_v51 = vld [vmem:[%s1772_s1 + $0x30] sm:$0xff]  ;;  %v1207_v53 = vld [vmem:[%s1772_s1 + $0x28] sm:$0xff]  ;;  %s1973_s7 = sld [smem:[#allocation16_spill]]  ;;  %s896_s29 = scalar_lea.sflag [#allocation5], %s491_s28 }
  0x98   : > { %v1217_v50 = vld [vmem:[%s1772_s1 + $0x78] sm:$0xff]  ;;  %765 = vmatpush.bf16.msra.mxu0 %v1209_v49  ;;  %1219 = vmatpush.bf16.msra.mxu2 %v1209_v49  ;;  %v1216_v52 = vld [vmem:[%s1772_s1 + $0x70] sm:$0xff]  ;;  %v1215_v54 = vld [vmem:[%s1772_s1 + $0x68] sm:$0xff] }
  0x99   : > { %814 = vmatpush.bf16.msra.mxu1 %v1217_v50  ;;  %1227 = vmatpush.bf16.msra.mxu3 %v1217_v50  ;;  %v1206_v55 = vld [vmem:[%s1772_s1 + $0x20] sm:$0xff]  ;;  %v1205_v57 = vld [vmem:[%s1772_s1 + $0x18] sm:$0xff]  ;;  %v1204_v59 = vld [vmem:[%s1772_s1 + $0x10] sm:$0xff] }
  0x9a   : > { %v1214_v56 = vld [vmem:[%s1772_s1 + $0x60] sm:$0xff]  ;;  %v1213_v58 = vld [vmem:[%s1772_s1 + $0x58] sm:$0xff]  ;;  %v1212_v60 = vld [vmem:[%s1772_s1 + $0x50] sm:$0xff] }
  0x9b   : > { %v1203_v61 = vld [vmem:[%s1772_s1 + $0x8] sm:$0xff]  ;;  %v1202_v63 = vld [vmem:[%s1772_s1] sm:$0xff]  ;;  %v1060_v13 = vld [vmem:[%s1770_s0 + $0x10] sm:$0xf] }
  0x9c   : > { %766 = vmatpush.bf16.msra.mxu0 %v1208_v51  ;;  %1220 = vmatpush.bf16.msra.mxu2 %v1208_v51  ;;  %v1211_v62 = vld [vmem:[%s1772_s1 + $0x48] sm:$0xff]  ;;  %v1210_v0 = vld [vmem:[%s1772_s1 + $0x40] sm:$0xff]  ;;  %v1189_v14 = vld [vmem:[%s1770_s0 + $0x14] sm:$0xf0] }
  0x9d   : > { %815 = vmatpush.bf16.msra.mxu1 %v1216_v52  ;;  %1228 = vmatpush.bf16.msra.mxu3 %v1216_v52  ;;  %v1052_v1 = vld [vmem:[%s1770_s0] sm:$0xf]  ;;  %v1187_v2 = vld [vmem:[%s1770_s0 + $0x4] sm:$0xf0]  ;;  %v1186_v5 = vld [vmem:[%s1770_s0 + $0x4] sm:$0xf]  ;;  %v1061_v21 = vor.u32 %v1189_v14, %v1060_v13 }
  0x9e   : > { %v1084_v3 = vld [vmem:[%s1770_s0 + $0x40] sm:$0xf]  ;;  %v1195_v4 = vld [vmem:[%s1770_s0 + $0x44] sm:$0xf0]  ;;  %v1054_v6 = vld [vmem:[%s1770_s0 + $0x8] sm:$0xf0]  ;;  %v1053_v9 = vor.u32 %v1187_v2, %v1052_v1 }
  0x9f   : > { %v1194_v7 = vld [vmem:[%s1770_s0 + $0x44] sm:$0xf]  ;;  %v1086_v8 = vld [vmem:[%s1770_s0 + $0x48] sm:$0xf0]  ;;  %v1085_v10 = vor.u32 %v1195_v4, %v1084_v3  ;;  %v1057_v11 = vor.u32 %v1186_v5, %v1054_v6  ;;  %v1092_v15 = vld [vmem:[%s1770_s0 + $0x50] sm:$0xf] }
  0xa0   : > { %767 = vmatpush.bf16.msra.mxu0 %v1207_v53  ;;  %1221 = vmatpush.bf16.msra.mxu2 %v1207_v53  ;;  %v1089_v12 = vor.u32 %v1194_v7, %v1086_v8  ;;  %v1197_v16 = vld [vmem:[%s1770_s0 + $0x54] sm:$0xf0]  ;;  %v1188_v17 = vld [vmem:[%s1770_s0 + $0x14] sm:$0xf]  ;;  %v1062_v18 = vld [vmem:[%s1770_s0 + $0x18] sm:$0xf0] }
  0xa1   : > { %816 = vmatpush.bf16.msra.mxu1 %v1215_v54  ;;  %1229 = vmatpush.bf16.msra.mxu3 %v1215_v54  ;;  %v1196_v19 = vld [vmem:[%s1770_s0 + $0x54] sm:$0xf]  ;;  %v1094_v20 = vld [vmem:[%s1770_s0 + $0x58] sm:$0xf0]  ;;  %v1093_v22 = vor.u32 %v1197_v16, %v1092_v15  ;;  %v1065_v23 = vor.u32 %v1188_v17, %v1062_v18  ;;  %v1068_v25 = vld [vmem:[%s1770_s0 + $0x20] sm:$0xf] }
  0xa2   : > { %v1097_v24 = vor.u32 %v1196_v19, %v1094_v20  ;;  %v1191_v26 = vld [vmem:[%s1770_s0 + $0x24] sm:$0xf0]  ;;  %v1100_v27 = vld [vmem:[%s1770_s0 + $0x60] sm:$0xf]  ;;  %v1190_v29 = vld [vmem:[%s1770_s0 + $0x24] sm:$0xf] }
  0xa3   : > { %v1199_v28 = vld [vmem:[%s1770_s0 + $0x64] sm:$0xf0]  ;;  %v1070_v30 = vld [vmem:[%s1770_s0 + $0x28] sm:$0xf0]  ;;  %v1198_v31 = vld [vmem:[%s1770_s0 + $0x64] sm:$0xf]  ;;  %v1069_v33 = vor.u32 %v1191_v26, %v1068_v25 }
  0xa4   : > { %768 = vmatpush.bf16.msra.mxu0 %v1206_v55  ;;  %1222 = vmatpush.bf16.msra.mxu2 %v1206_v55  ;;  %v1102_v32 = vld [vmem:[%s1770_s0 + $0x68] sm:$0xf0]  ;;  %v1101_v34 = vor.u32 %v1199_v28, %v1100_v27  ;;  %v1073_v35 = vor.u32 %v1190_v29, %v1070_v30  ;;  %v1076_v37 = vld [vmem:[%s1770_s0 + $0x30] sm:$0xf]  ;;  %v1193_v38 = vld [vmem:[%s1770_s0 + $0x34] sm:$0xf0] }
  0xa5   : > { %817 = vmatpush.bf16.msra.mxu1 %v1214_v56  ;;  %1230 = vmatpush.bf16.msra.mxu3 %v1214_v56  ;;  %v1105_v36 = vor.u32 %v1198_v31, %v1102_v32  ;;  %v1108_v39 = vld [vmem:[%s1770_s0 + $0x70] sm:$0xf]  ;;  %v1201_v40 = vld [vmem:[%s1770_s0 + $0x74] sm:$0xf0]  ;;  %v1192_v41 = vld [vmem:[%s1770_s0 + $0x34] sm:$0xf]  ;;  %v1077_v45 = vor.u32 %v1193_v38, %v1076_v37 }
  0xa6   : > { %v1078_v42 = vld [vmem:[%s1770_s0 + $0x38] sm:$0xf0]  ;;  %v1200_v43 = vld [vmem:[%s1770_s0 + $0x74] sm:$0xf]  ;;  %v1109_v46 = vor.u32 %v1201_v40, %v1108_v39  ;;  %v525_v50 = vld [vmem:[%s1774_s30] sm:$0xff]  ;;  %s1378_s9 = scalar_lea.hbm %s1973_s7, 512 }
  0xa7   : > { %v1110_v44 = vld [vmem:[%s1770_s0 + $0x78] sm:$0xf0]  ;;  %v1081_v47 = vor.u32 %v1192_v41, %v1078_v42  ;;  %v533_v55 = vld [vmem:[%s1774_s30 + $0x40] sm:$0xff]  ;;  %v534_v1 = vld [vmem:[%s1774_s30 + $0x48] sm:$0xff]  ;;  %s1972_s0 = sld [smem:[#allocation8_spill]] }
  0xa8   : > { %769 = vmatpush.bf16.msra.mxu0 %v1205_v57  ;;  %1223 = vmatpush.bf16.msra.mxu2 %v1205_v57  ;;  %v1113_v48 = vor.u32 %v1200_v43, %v1110_v44  ;;  %v527_v5 = vld [vmem:[%s1774_s30 + $0x10] sm:$0xff]  ;;  %v528_v15 = vld [vmem:[%s1774_s30 + $0x18] sm:$0xff]  ;;  %v529_v25 = vld [vmem:[%s1774_s30 + $0x20] sm:$0xff] }
  0xa9   : > { %818 = vmatpush.bf16.msra.mxu1 %v1213_v58  ;;  %1231 = vmatpush.bf16.msra.mxu3 %v1213_v58  ;;  %v537_v31 = vld [vmem:[%s1774_s30 + $0x60] sm:$0xff]  ;;  %v538_v41 = vld [vmem:[%s1774_s30 + $0x68] sm:$0xff] }
  0xac   : > { %770 = vmatpush.bf16.msra.mxu0 %v1204_v59  ;;  %1224 = vmatpush.bf16.msra.mxu2 %v1204_v59  ;;  %v526_v59 = vld [vmem:[%s1774_s30 + $0x8] sm:$0xff] }
  0xad   : > { %819 = vmatpush.bf16.msra.mxu1 %v1212_v60  ;;  %1232 = vmatpush.bf16.msra.mxu3 %v1212_v60  ;;  %s1218_s1 = sshll.u32 %s1972_s0, 5 }
  0xae   : > { %s907_s15 = sadd.s32 %s1480_s20, %s1218_s1  ;;  %s910_s20 = sshll.u32 %s1774_s30, 4  ;;  %s911_s20 = int_to_ptr.vmem [resolvable:$true] %s910_s20 }
  0xaf   : > { %s1181_s17 = sshll.u32 %s907_s15, 3 }
  0xb0   : > { %771 = vmatpush.bf16.msra.mxu0 %v1203_v61  ;;  %1225 = vmatpush.bf16.msra.mxu2 %v1203_v61  ;;  %s909_s3 = scalar_lea.hbm %s1973_s7, %s1181_s17 }
  0xb1   : > { %820 = vmatpush.bf16.msra.mxu1 %v1211_v62  ;;  %1233 = vmatpush.bf16.msra.mxu3 %v1211_v62  ;;  %s912_s26 = sshll.u32 %s909_s3, 4  ;;  %s913_s26 = int_to_ptr.hbm [resolvable:$true] %s912_s26 }
  0xb2   : > { %s1372_s4 = sshra.s32 %s913_s26, 4  ;;  %s1373_s4 = int_to_ptr.hbm [resolvable:$true] %s1372_s4 }
  0xb3   : > { %s1374_s5 = scalar_lea.hbm %s1373_s4, 128  ;;  %p1379_p12 = scmp.lt.s32.totalorder %s1373_s4, %s1973_s7 }
  0xb4   : > { %772 = vmatpush.bf16.msra.mxu0 %v1202_v63  ;;  %1226 = vmatpush.bf16.msra.mxu2 %v1202_v63  ;;  %p1375_p9 = scmp.ne.s32.totalorder %s1373_s4, %s1374_s5  ;;  %p1380_p13 = scmp.lt.s32.totalorder %s1378_s9, %s1374_s5 }
  0xb5   : > { %821 = vmatpush.bf16.msra.mxu1 %v1210_v0  ;;  %1234 = vmatpush.bf16.msra.mxu3 %v1210_v0 }
  0xb6   : > { %p1376_p10 = pnand %p1375_p9, %p1645_p0  ;;  %p1381_p1 = por %p1380_p13, %p1379_p12 }
  0xb7   : > { %773 = vmatmul.bf16.vlgmr.msra.gmra.mxu0 %v1053_v9  ;;  %793 = vmatmul.bf16.vlgmr.msra.gmra.mxu2 %v1085_v10 }
  0xb8   : > { %822 = vmatmul.bf16.vlgmr.msra.gmra.mxu1 %v1057_v11  ;;  %842 = vmatmul.bf16.vlgmr.msra.gmra.mxu3 %v1089_v12  ;;  %v535_v11 = vld [vmem:[%s1774_s30 + $0x50] sm:$0xff]  ;;  %p1377_p11 = pneg %p1376_p10 }
  0xba   : > { %p1382_p3 = pnand %p1381_p1, %p1377_p11 }
  0xc7   : > { %778 = vmatmul.bf16.gmra.mxu0 %v1061_v21  ;;  %798 = vmatmul.bf16.gmra.mxu2 %v1093_v22  ;;  %v536_v21 = vld [vmem:[%s1774_s30 + $0x58] sm:$0xff] }
  0xc8   : > { %827 = vmatmul.bf16.gmra.mxu1 %v1065_v23  ;;  %847 = vmatmul.bf16.gmra.mxu3 %v1097_v24 }
  0xd7   : > { %783 = vmatmul.bf16.gmra.mxu0 %v1069_v33  ;;  %803 = vmatmul.bf16.gmra.mxu2 %v1101_v34 }
  0xd8   : > { %832 = vmatmul.bf16.gmra.mxu1 %v1073_v35  ;;  %852 = vmatmul.bf16.gmra.mxu3 %v1105_v36  ;;  %v530_v35 = vld [vmem:[%s1774_s30 + $0x28] sm:$0xff] }
  0xe7   : > { %788 = vmatmul.bf16.gmra.mxu0 %v1077_v45  ;;  %808 = vmatmul.bf16.gmra.mxu2 %v1109_v46  ;;  %v531_v45 = vld [vmem:[%s1774_s30 + $0x30] sm:$0xff] }
  0xe8   : > { %837 = vmatmul.bf16.gmra.mxu1 %v1081_v47  ;;  %857 = vmatmul.bf16.gmra.mxu3 %v1113_v48 }
 0x134   : > { %v774_v49 = vpop.f32.mrf.mxu0 }
 0x135   : > { %v823_v51 = vpop.f32.mrf.mxu1 }
 0x136   : > { %v824_v52 = vadd.f32 %v823_v51, %v774_v49  ;;  %v539_v51 = vld [vmem:[%s1774_s30 + $0x70] sm:$0xff] }
 0x138   : > { %v863_v53 = vadd.f32 %v824_v52, %v525_v50 }
 0x13a   : > { %879 = vst [vmem:[%s1774_s30] sm:$0xff] %v863_v53  ;;  %v794_v54 = vpop.f32.mrf.mxu2 }
 0x13b   : > { %v843_v56 = vpop.f32.mrf.mxu3 }
 0x13c   : > { %v844_v57 = vadd.f32 %v843_v56, %v794_v54  ;;  %v776_v58 = vpop.f32.mrf.mxu0 }
 0x13d   : > { %v825_v60 = vpop.f32.mrf.mxu1 }
 0x13e   : > { %v871_v61 = vadd.f32 %v844_v57, %v533_v55  ;;  %v826_v62 = vadd.f32 %v825_v60, %v776_v58  ;;  %v532_v55 = vld [vmem:[%s1774_s30 + $0x38] sm:$0xff] }
 0x140   : > { %887 = vst [vmem:[%s1774_s30 + $0x40] sm:$0xff] %v871_v61  ;;  %v864_v63 = vadd.f32 %v826_v62, %v526_v59  ;;  %v540_v61 = vld [vmem:[%s1774_s30 + $0x78] sm:$0xff] }
 0x142   : > { %880 = vst [vmem:[%s1774_s30 + $0x8] sm:$0xff] %v864_v63  ;;  %v796_v0 = vpop.f32.mrf.mxu2 }
 0x143   : > { %v845_v2 = vpop.f32.mrf.mxu3 }
 0x144   : > { %v846_v3 = vadd.f32 %v845_v2, %v796_v0  ;;  %v779_v4 = vpop.f32.mrf.mxu0 }
 0x145   : > { %v828_v6 = vpop.f32.mrf.mxu1 }
 0x146   : > { %v872_v7 = vadd.f32 %v846_v3, %v534_v1  ;;  %v829_v8 = vadd.f32 %v828_v6, %v779_v4 }
 0x148   : > { %888 = vst [vmem:[%s1774_s30 + $0x48] sm:$0xff] %v872_v7  ;;  %v865_v9 = vadd.f32 %v829_v8, %v527_v5 }
 0x14a   : > { %881 = vst [vmem:[%s1774_s30 + $0x10] sm:$0xff] %v865_v9  ;;  %v799_v10 = vpop.f32.mrf.mxu2 }
 0x14b   : > { %v848_v12 = vpop.f32.mrf.mxu3 }
 0x14c   : > { %v849_v13 = vadd.f32 %v848_v12, %v799_v10  ;;  %v781_v14 = vpop.f32.mrf.mxu0 }
 0x14d   : > { %v830_v16 = vpop.f32.mrf.mxu1 }
 0x14e   : > { %v873_v17 = vadd.f32 %v849_v13, %v535_v11  ;;  %v831_v18 = vadd.f32 %v830_v16, %v781_v14 }
 0x150   : > { %889 = vst [vmem:[%s1774_s30 + $0x50] sm:$0xff] %v873_v17  ;;  %v866_v19 = vadd.f32 %v831_v18, %v528_v15 }
 0x152   : > { %882 = vst [vmem:[%s1774_s30 + $0x18] sm:$0xff] %v866_v19  ;;  %v801_v20 = vpop.f32.mrf.mxu2 }
 0x153   : > { %v850_v22 = vpop.f32.mrf.mxu3 }
 0x154   : > { %v851_v23 = vadd.f32 %v850_v22, %v801_v20  ;;  %v784_v24 = vpop.f32.mrf.mxu0 }
 0x155   : > { %v833_v26 = vpop.f32.mrf.mxu1 }
 0x156   : > { %v874_v27 = vadd.f32 %v851_v23, %v536_v21  ;;  %v834_v28 = vadd.f32 %v833_v26, %v784_v24 }
 0x158   : > { %890 = vst [vmem:[%s1774_s30 + $0x58] sm:$0xff] %v874_v27  ;;  %v867_v29 = vadd.f32 %v834_v28, %v529_v25 }
 0x15a   : > { %883 = vst [vmem:[%s1774_s30 + $0x20] sm:$0xff] %v867_v29  ;;  %v804_v30 = vpop.f32.mrf.mxu2 }
 0x15b   : > { %v853_v32 = vpop.f32.mrf.mxu3 }
 0x15c   : > { %v854_v33 = vadd.f32 %v853_v32, %v804_v30  ;;  %v786_v34 = vpop.f32.mrf.mxu0 }
 0x15d   : > { %v835_v36 = vpop.f32.mrf.mxu1 }
 0x15e   : > { %v875_v37 = vadd.f32 %v854_v33, %v537_v31  ;;  %v836_v38 = vadd.f32 %v835_v36, %v786_v34 }
 0x160   : > { %891 = vst [vmem:[%s1774_s30 + $0x60] sm:$0xff] %v875_v37  ;;  %v868_v39 = vadd.f32 %v836_v38, %v530_v35 }
 0x162   : > { %884 = vst [vmem:[%s1774_s30 + $0x28] sm:$0xff] %v868_v39  ;;  %v806_v40 = vpop.f32.mrf.mxu2 }
 0x163   : > { %v855_v42 = vpop.f32.mrf.mxu3 }
 0x164   : > { %v856_v43 = vadd.f32 %v855_v42, %v806_v40  ;;  %v789_v44 = vpop.f32.mrf.mxu0 }
 0x165   : > { %v838_v46 = vpop.f32.mrf.mxu1 }
 0x166   : > { %v876_v47 = vadd.f32 %v856_v43, %v538_v41  ;;  %v839_v48 = vadd.f32 %v838_v46, %v789_v44 }
 0x168   : > { %892 = vst [vmem:[%s1774_s30 + $0x68] sm:$0xff] %v876_v47  ;;  %v869_v49 = vadd.f32 %v839_v48, %v531_v45 }
 0x16a   : > { %885 = vst [vmem:[%s1774_s30 + $0x30] sm:$0xff] %v869_v49  ;;  %v809_v50 = vpop.f32.mrf.mxu2 }
 0x16b   : > { %v858_v52 = vpop.f32.mrf.mxu3 }
 0x16c   : > { %v859_v53 = vadd.f32 %v858_v52, %v809_v50  ;;  %v791_v54 = vpop.f32.mrf.mxu0 }
 0x16d   : > { %v840_v56 = vpop.f32.mrf.mxu1 }
 0x16e   : > { %v877_v57 = vadd.f32 %v859_v53, %v539_v51  ;;  %v841_v58 = vadd.f32 %v840_v56, %v791_v54 }
 0x170   : > { %893 = vst [vmem:[%s1774_s30 + $0x70] sm:$0xff] %v877_v57  ;;  %v870_v59 = vadd.f32 %v841_v58, %v532_v55 }
 0x172   : > { %886 = vst [vmem:[%s1774_s30 + $0x38] sm:$0xff] %v870_v59  ;;  %v811_v60 = vpop.f32.mrf.mxu2 }
 0x173   : > { %v860_v62 = vpop.f32.mrf.mxu3 }
 0x174   : > { %v861_v63 = vadd.f32 %v860_v62, %v811_v60 }
 0x176   : > { %v878_v0 = vadd.f32 %v861_v63, %v540_v61 }
 0x178   : > { %894 = vst [vmem:[%s1774_s30 + $0x78] sm:$0xff] %v878_v0 }
 0x179   : > { %1385 = shalt.err (!%p1382_p3)
}
 0x17a   : > { %s1502_s30 = smov 128   ;;  %s1503_s28 = smov 256  }
 0x17b   : > { %s1504_s15 = smov 8  }
 0x17c   : > { %1235 = dma.vmem_to_hbm [thread:$0]  (%p1645_p0), %s911_s20, 2048, %s913_s26, %s896_s29, %s1502_s30, %s1503_s28, %s1504_s15  }
 0x17d PF: > { %p1241_p4 = scmp.ge.s32.totalorder %s1500_s25, 2  ;;  %s927_s17 = sand.u32 1, %s1448_s12  }
 0x17e   : > { %s928_s24 = scalar_lea.sflag [#allocation5], %s927_s17 }
 0x17f   : > { %p1238_p5 = pnand %p1241_p4, %p1651_p2 }
 0x181   : > { %p1239_p6 = pneg %p1238_p5 }
 0x183   : > { %1443 = dma.done.wait (%p1239_p6), %s928_s24, 2048  }
 0x184   : > { %1445 = vsyncadd (%p1239_p6), %s928_s24, 4294965248  ;;  %s16_s25 = sadd.s32 1, %s1500_s25   ;;  %s1975_s10 = sld [smem:[#allocation9_spill]] }
 0x185   : > { %p1896_p7 = scmp.ge.s32.totalorder %s16_s25, 10   ;;  %s1976_s6 = sld [smem:[#allocation10_spill]] }
 0x186   : > { %s1977_s3 = sld [smem:[#allocation11_spill]]  ;;  %s1979_s12 = smov %s1452_s13 }
 0x187   : > { %s1978_s24 = sld [smem:[#allocation12_spill]]  ;;  %s1980_s13 = smov %s1456_s14 }
 0x188   : > { %s1981_s14 = smov %s1643_s19  ;;  %s1982_s15 = smov %s1464_s16 }
 0x189   : > { %s1983_s16 = smov %s1629_s27  ;;  %s1984_s17 = smov %s1472_s18 }
 0x18a   : > { %s1985_s18 = smov %s1640_s21  ;;  %s1986_s19 = smov %s1488_s22 }
 0x18b   : > { %s1987_s20 = smov %s1492_s23  ;;  %s1988_s21 = smov %s1975_s10 }
 0x18c   : > { %s1989_s22 = smov %s1976_s6  ;;  %s1990_s23 = smov %s1977_s3 }
 0x18d   :  { %15 = sbr.rel (!%p1896_p7) target bundleno = 13 (0xd), region = 166 }
 0x192   :  { %934 = vsyncpa [#allocation5], 1 }
 0x193   :  { %936 = vsyncpa [#allocation5 + $0x1], 1 }

</bundles_post_ra>
